<compile_context>
chip_gen: v7x
topology: tpu7x:2x2x1
jax: 0.10.0
libtpu: 0.0.40
codegen_flags: <defaults>
</compile_context>

<pallas_src>
import functools

import jax
import jax.numpy as jnp
from jax.experimental import pallas as pl
from jax.experimental.pallas import tpu as pltpu

LANE_W = 512        # lane-dense last dim (multiple of 128)
BLOCK_ROWS = 512    # 512 x 512 x f32 = 1 MiB per input block
EPS = 1e-12


def _cdiv(a, b):
    return -(-a // b)


def _static_pow(x, e):
    """x ** e with a static Python exponent.

    Small integer exponents are expanded to VPU multiplies (square-and-multiply)
    instead of jnp.power, which would lower to exp(e*log(x)) on the single EUP
    slot and saturate it.
    """
    ef = float(e)
    if ef.is_integer() and 0 <= ef <= 16:
        n = int(ef)
        if n == 0:
            return jnp.ones_like(x)
        acc = None
        base = x
        while n:
            if n & 1:
                acc = base if acc is None else acc * base
            n >>= 1
            if n:
                base = base * base
        return acc
    return jnp.power(x, ef)  # fallback for non-integer exponents


def _focal_elementwise(p, t, alpha, gamma):
    # pos = -log(p + eps)     * (1 - p)^alpha * t
    # neg = -log(1 - p + eps) * p^alpha       * (1 - t)^gamma
    pos = -jnp.log(p + EPS) * _static_pow(1.0 - p, alpha) * t
    neg = -jnp.log(1.0 - p + EPS) * _static_pow(p, alpha) * _static_pow(1.0 - t, gamma)
    return pos + neg


def _tile_params(n):
    """Static tiling of a flat length-n array viewed as (rows, LANE_W)."""
    rows = max(_cdiv(n, LANE_W), 1)
    if rows <= BLOCK_ROWS:
        block_rows = rows            # full-extent block (no (8,128) constraint)
        blocks = 1
    else:
        block_rows = BLOCK_ROWS
        blocks = _cdiv(rows, block_rows)
    n_splits = 2 if blocks >= 2 else 1   # 2-way outer split -> megacore on v7x
    nb = _cdiv(blocks, n_splits)
    return rows, block_rows, blocks, n_splits, nb


def _prepare(x, rows):
    """Flatten + (only-if-needed, <LANE_W elements) zero-pad + reshape.

    No dtype cast here: the kernel casts to f32, so bf16/f16 inputs keep their
    narrow HBM footprint.
    """
    flat = x.reshape(-1)
    pad = rows * LANE_W - flat.shape[0]
    if pad:
        flat = jnp.pad(flat, (0, pad))
    return flat.reshape(rows, LANE_W)


# ---------------------------------------------------------------------------
# Kernels
# ---------------------------------------------------------------------------

def _focal_sum_kernel(*refs, alpha, gamma, scale, mask_info, has_weight):
    """Accumulate the (optionally weighted) focal-loss sum over the grid."""
    if has_weight:
        pred_ref, tgt_ref, w_ref, out_ref, acc_ref = refs
    else:
        pred_ref, tgt_ref, out_ref, acc_ref = refs
        w_ref = None

    i = pl.program_id(1)

    @pl.when(i == 0)
    def _():
        acc_ref[...] = jnp.zeros_like(acc_ref)

    p = pred_ref[...].astype(jnp.float32)
    t = tgt_ref[...].astype(jnp.float32)
    loss = _focal_elementwise(p, t, alpha, gamma)
    if w_ref is not None:
        loss = loss * w_ref[...].astype(jnp.float32)

    if mask_info is not None:
        # Zero-out rows/lanes beyond the true element count (lane padding,
        # ragged trailing block, and the possible duplicated overhang block).
        nb, block_rows, full_rows, rem = mask_info
        c = pl.program_id(0)
        row0 = (c * nb + i) * block_rows
        grow = row0 + jax.lax.broadcasted_iota(jnp.int32, loss.shape, 0)
        valid = grow < full_rows
        if rem:
            col = jax.lax.broadcasted_iota(jnp.int32, loss.shape, 1)
            valid = valid | ((grow == full_rows) & (col < rem))
        loss = jnp.where(valid, loss, 0.0)

    # Pure-VPU block accumulation; cross-lane reduction deferred to the final
    # grid step of this split.
    acc_ref[...] += loss

    @pl.when(i == pl.num_programs(1) - 1)
    def _():
        s = jnp.sum(acc_ref[...])
        if scale != 1.0:
            s = s * scale
        out_ref[...] = jnp.broadcast_to(s, out_ref.shape)


def _focal_elem_kernel(*refs, alpha, gamma, scale, has_weight):
    """Elementwise (optionally weighted) focal loss, no reduction."""
    if has_weight:
        pred_ref, tgt_ref, w_ref, out_ref = refs
    else:
        pred_ref, tgt_ref, out_ref = refs
        w_ref = None

    p = pred_ref[...].astype(jnp.float32)
    t = tgt_ref[...].astype(jnp.float32)
    loss = _focal_elementwise(p, t, alpha, gamma)
    if w_ref is not None:
        loss = loss * w_ref[...].astype(jnp.float32)
    if scale != 1.0:
        loss = loss * scale
    out_ref[...] = loss.astype(out_ref.dtype)


# ---------------------------------------------------------------------------
# pallas_call wrappers
# ---------------------------------------------------------------------------

def focal_loss_pallas_sum(pred, target, weight=None, alpha=2.0, gamma=4.0,
                          scale=1.0):
    """Returns scale * SUM(elementwise focal loss [* weight]) as an f32 scalar."""
    n = int(pred.size)
    rows, block_rows, blocks, n_splits, nb = _tile_params(n)

    covered = n_splits * nb * block_rows * LANE_W
    mask_info = None
    if covered != n:
        mask_info = (nb, block_rows, n // LANE_W, n % LANE_W)

    inputs = [_prepare(pred, rows), _prepare(target, rows)]
    if weight is not None:
        inputs.append(_prepare(jnp.broadcast_to(weight, pred.shape), rows))

    def in_idx(c, i):
        # Clamp so a possible overhang step (odd block count split 2-way)
        # re-reads the last valid block; its contribution is masked to zero.
        return (jnp.minimum(c * nb + i, blocks - 1), 0)

    in_spec = pl.BlockSpec((block_rows, LANE_W), in_idx)
    kernel = functools.partial(
        _focal_sum_kernel, alpha=alpha, gamma=gamma, scale=float(scale),
        mask_info=mask_info, has_weight=weight is not None)

    out = pl.pallas_call(
        kernel,
        out_shape=jax.ShapeDtypeStruct((n_splits * 8, 128), jnp.float32),
        grid_spec=pltpu.PrefetchScalarGridSpec(
            num_scalar_prefetch=0,
            grid=(n_splits, nb),
            in_specs=[in_spec] * len(inputs),
            out_specs=pl.BlockSpec((8, 128), lambda c, i: (c, 0)),
            scratch_shapes=[pltpu.VMEM((block_rows, LANE_W), jnp.float32)],
        ),
        compiler_params=pltpu.CompilerParams(
            dimension_semantics=("parallel", "arbitrary")),
    )(*inputs)

    # One partial per split (the whole (8,128) block holds the same value).
    partials = out.reshape(n_splits, 8, 128)[:, 0, 0]
    return jnp.sum(partials)


def focal_loss_pallas_none(pred, target, weight=None, alpha=2.0, gamma=4.0,
                           scale=1.0):
    """Returns scale * elementwise focal loss [* weight], shape = pred.shape."""
    n = int(pred.size)
    rows, block_rows, blocks, _, _ = _tile_params(n)

    inputs = [_prepare(pred, rows), _prepare(target, rows)]
    if weight is not None:
        inputs.append(_prepare(jnp.broadcast_to(weight, pred.shape), rows))

    spec = pl.BlockSpec((block_rows, LANE_W), lambda i: (i, 0))
    kernel = functools.partial(
        _focal_elem_kernel, alpha=alpha, gamma=gamma, scale=float(scale),
        has_weight=weight is not None)

    out = pl.pallas_call(
        kernel,
        out_shape=jax.ShapeDtypeStruct((rows, LANE_W), pred.dtype),
        grid_spec=pltpu.PrefetchScalarGridSpec(
            num_scalar_prefetch=0,
            grid=(blocks,),
            in_specs=[spec] * len(inputs),
            out_specs=spec,
        ),
        compiler_params=pltpu.CompilerParams(
            dimension_semantics=("parallel",)),
    )(*inputs)

    flat = out.reshape(-1)
    if rows * LANE_W != n:
        flat = flat[:n]
    return flat.reshape(pred.shape)


# ---------------------------------------------------------------------------
# Module-equivalent wrapper
# ---------------------------------------------------------------------------

class FocalLossPallas:
    """JAX/Pallas port of the PyTorch FocalLoss module (GaussianFocalLoss)."""

    def __init__(self, alpha=2.0, gamma=4.0, reduction='mean', loss_weight=1.0):
        self.alpha = alpha
        self.gamma = gamma
        self.reduction = reduction
        self.loss_weight = loss_weight

    def _single(self, pred, target, weight, reduction, avg_factor):
        if reduction == 'none':
            # Elementwise (optionally weighted); loss_weight fused in-kernel.
            # (Matches torch: reduction='none' ignores avg_factor and returns
            #  the unreduced loss.)
            return focal_loss_pallas_none(pred, target, weight,
                                          self.alpha, self.gamma,
                                          scale=self.loss_weight)

        if avg_factor is not None and reduction == 'sum':
            raise ValueError('avg_factor can not be used with reduction="sum"')

        # 'mean' / 'sum' hot path: weighted sum fused into a single HBM pass.
        scale = float(self.loss_weight)
        if reduction == 'mean' and avg_factor is None:
            scale = scale / float(pred.size)       # fold static denominator
        s = focal_loss_pallas_sum(pred, target, weight,
                                  self.alpha, self.gamma, scale=scale)
        if reduction == 'mean' and avg_factor is not None:
            s = s / avg_factor
        return s.astype(pred.dtype)

    def __call__(self, preds, target, weight=None, avg_factor=None,
                 reduction_override=None):
        assert reduction_override in (None, 'none', 'mean', 'sum')
        reduction = reduction_override if reduction_override else self.reduction
        if isinstance(preds, (list, tuple)):
            loss_total = 0.0
            for pred in preds:
                loss_total = loss_total + self._single(
                    pred, target, weight, reduction, avg_factor)
            return loss_total / len(preds)
        return self._single(preds, target, weight, reduction, avg_factor)


# ---------------------------------------------------------------------------
# Reference + smoke test
# ---------------------------------------------------------------------------

def _reference_elementwise(pred, target, alpha=2.0, gamma=4.0):
    pred = pred.astype(jnp.float32)
    target = target.astype(jnp.float32)
    pos = -jnp.log(pred + EPS) * (1.0 - pred) ** alpha * target
    neg = -jnp.log(1.0 - pred + EPS) * pred ** alpha * (1.0 - target) ** gamma
    return pos + neg


if __name__ == "__main__":
    key = jax.random.PRNGKey(0)
    k1, k2, k3 = jax.random.split(key, 3)
    B, C, H, W = 2, 4, 16, 16  # NCHW, same convention as the torch module
    # predictions in (0, 1) (post-sigmoid heatmap); target is a gaussian heatmap
    pred = jax.nn.sigmoid(jax.random.normal(k1, (B, C, H, W), jnp.float32))
    target = jax.random.uniform(k2, (B, C, H, W), jnp.float32)

    loss_mod = FocalLossPallas(alpha=2.0, gamma=4.0, reduction='mean',
                               loss_weight=1.0)

    # 'mean' path
    out = jax.block_until_ready(loss_mod(pred, target))
    ref_elem = _reference_elementwise(pred, target, 2.0, 4.0)
    ref_mean = jnp.mean(ref_elem)
    assert jnp.allclose(out, ref_mean, rtol=1e-5, atol=1e-6), (out, ref_mean)

    # 'none' path
    none_out = jax.block_until_ready(
        loss_mod(pred, target, reduction_override='none'))
    assert none_out.shape == pred.shape
    assert jnp.allclose(none_out, ref_elem, rtol=1e-5, atol=1e-6)

    # weighted 'sum' path (exercises the fused 3-input kernel)
    wgt = jax.random.uniform(k3, (B, C, H, W), jnp.float32)
    sum_out = jax.block_until_ready(
        loss_mod(pred, target, weight=wgt, reduction_override='sum'))
    ref_sum = jnp.sum(ref_elem * wgt)
    assert jnp.allclose(sum_out, ref_sum, rtol=1e-4, atol=1e-4), (sum_out, ref_sum)

    print("KERNEL_OK")
</pallas_src>

<mosaic_0001>
module attributes {stable_mosaic.version = 11 : i64} {
  func.func @_focal_sum_kernel(%arg0: i32, %arg1: i32, %arg2: memref<4x512xf32, #tpu.memory_space<vmem>>, %arg3: memref<4x512xf32, #tpu.memory_space<vmem>>, %arg4: memref<8x128xf32, #tpu.memory_space<vmem>>, %arg5: memref<4x512xf32, #tpu.memory_space<vmem>>) attributes {dimension_semantics = [#tpu.dimension_semantics<parallel>, #tpu.dimension_semantics<arbitrary>], iteration_bounds = array<i64: 1, 1>, scalar_prefetch = 0 : i64, scratch_operands = 1 : i64, tpu.core_type = #tpu.core_type<tc>, window_params = [{transform_indices = @transform_0, window_bounds = array<i64: 4, 512>}, {transform_indices = @transform_1, window_bounds = array<i64: 4, 512>}, {transform_indices = @transform_2, window_bounds = array<i64: 8, 128>}]} {
    %c0_i32 = arith.constant 0 : i32
    %0 = arith.cmpi eq, %arg1, %c0_i32 : i32
    %1 = arith.extui %0 : i1 to i32
    %c0_i32_0 = arith.constant 0 : i32
    %2 = arith.cmpi ne, %1, %c0_i32_0 : i32
    scf.if %2 {
      %cst_16 = arith.constant 0.000000e+00 : f32
      %36 = vector.broadcast %cst_16 : f32 to vector<4x512xf32>
      %c0_17 = arith.constant 0 : index
      %c0_18 = arith.constant 0 : index
      %37 = vector.load %arg5[%c0_17, %c0_18] : memref<4x512xf32, #tpu.memory_space<vmem>>, vector<4x512xf32>
      tpu.vector_store %arg5[%c0_17, %c0_18], %36 {strides = array<i32>} : memref<4x512xf32, #tpu.memory_space<vmem>>, vector<4x512xf32>,
    } else {
    }
    %c0 = arith.constant 0 : index
    %c0_1 = arith.constant 0 : index
    %3 = vector.load %arg2[%c0, %c0_1] : memref<4x512xf32, #tpu.memory_space<vmem>>, vector<4x512xf32>
    %c0_2 = arith.constant 0 : index
    %c0_3 = arith.constant 0 : index
    %4 = vector.load %arg3[%c0_2, %c0_3] : memref<4x512xf32, #tpu.memory_space<vmem>>, vector<4x512xf32>
    %cst = arith.constant 9.99999996E-13 : f32
    %5 = vector.broadcast %cst : f32 to vector<4x512xf32>
    %6 = arith.addf %3, %5 : vector<4x512xf32>
    %7 = math.log %6 : vector<4x512xf32>
    %cst_4 = arith.constant 0.000000e+00 : f32
    %8 = vector.broadcast %cst_4 : f32 to vector<4x512xf32>
    %9 = arith.subf %8, %7 : vector<4x512xf32>
    %cst_5 = arith.constant 1.000000e+00 : f32
    %10 = vector.broadcast %cst_5 : f32 to vector<4x512xf32>
    %11 = arith.subf %10, %3 : vector<4x512xf32>
    %12 = arith.mulf %11, %11 : vector<4x512xf32>
    %13 = arith.mulf %9, %12 : vector<4x512xf32>
    %14 = arith.mulf %13, %4 : vector<4x512xf32>
    %cst_6 = arith.constant 1.000000e+00 : f32
    %15 = vector.broadcast %cst_6 : f32 to vector<4x512xf32>
    %16 = arith.subf %15, %3 : vector<4x512xf32>
    %cst_7 = arith.constant 9.99999996E-13 : f32
    %17 = vector.broadcast %cst_7 : f32 to vector<4x512xf32>
    %18 = arith.addf %16, %17 : vector<4x512xf32>
    %19 = math.log %18 : vector<4x512xf32>
    %cst_8 = arith.constant 0.000000e+00 : f32
    %20 = vector.broadcast %cst_8 : f32 to vector<4x512xf32>
    %21 = arith.subf %20, %19 : vector<4x512xf32>
    %22 = arith.mulf %3, %3 : vector<4x512xf32>
    %23 = arith.mulf %21, %22 : vector<4x512xf32>
    %cst_9 = arith.constant 1.000000e+00 : f32
    %24 = vector.broadcast %cst_9 : f32 to vector<4x512xf32>
    %25 = arith.subf %24, %4 : vector<4x512xf32>
    %26 = arith.mulf %25, %25 : vector<4x512xf32>
    %27 = arith.mulf %26, %26 : vector<4x512xf32>
    %28 = arith.mulf %23, %27 : vector<4x512xf32>
    %29 = arith.addf %14, %28 : vector<4x512xf32>
    %c0_10 = arith.constant 0 : index
    %c0_11 = arith.constant 0 : index
    %30 = vector.load %arg5[%c0_10, %c0_11] : memref<4x512xf32, #tpu.memory_space<vmem>>, vector<4x512xf32>
    %31 = arith.addf %30, %29 : vector<4x512xf32>
    %c0_12 = arith.constant 0 : index
    %c0_13 = arith.constant 0 : index
    %32 = vector.load %arg5[%c0_12, %c0_13] : memref<4x512xf32, #tpu.memory_space<vmem>>, vector<4x512xf32>
    tpu.vector_store %arg5[%c0_12, %c0_13], %31 {strides = array<i32>} : memref<4x512xf32, #tpu.memory_space<vmem>>, vector<4x512xf32>,
    %c0_i32_14 = arith.constant 0 : i32
    %33 = arith.cmpi eq, %arg1, %c0_i32_14 : i32
    %34 = arith.extui %33 : i1 to i32
    %c0_i32_15 = arith.constant 0 : i32
    %35 = arith.cmpi ne, %34, %c0_i32_15 : i32
    scf.if %35 {
      %c0_16 = arith.constant 0 : index
      %c0_17 = arith.constant 0 : index
      %36 = vector.load %arg5[%c0_16, %c0_17] : memref<4x512xf32, #tpu.memory_space<vmem>>, vector<4x512xf32>
      %37 = vector.shape_cast %36 : vector<4x512xf32> to vector<1x4x512xf32>
      %cst_18 = arith.constant dense<0.000000e+00> : vector<1xf32>
      %38 = vector.multi_reduction <add>, %37, %cst_18 [1, 2] : vector<1x4x512xf32> to vector<1xf32>
      %39 = vector.shape_cast %38 : vector<1xf32> to vector<1x1x1xf32>
      %40 = vector.extract %39[0, 0, 0] : f32 from vector<1x1x1xf32>
      %cst_19 = arith.constant 4.8828125E-4 : f32
      %41 = arith.mulf %40, %cst_19 : f32
      %42 = vector.broadcast %41 : f32 to vector<8x128xf32>
      %c0_20 = arith.constant 0 : index
      %c0_21 = arith.constant 0 : index
      %43 = vector.load %arg4[%c0_20, %c0_21] : memref<8x128xf32, #tpu.memory_space<vmem>>, vector<8x128xf32>
      tpu.vector_store %arg4[%c0_20, %c0_21], %42 {strides = array<i32>} : memref<8x128xf32, #tpu.memory_space<vmem>>, vector<8x128xf32>,
    } else {
    }
    return
  }
  func.func @transform_0(%arg0: i32, %arg1: i32) -> (i32, i32) {
    %c1_i32 = arith.constant 1 : i32
    %0 = arith.muli %arg0, %c1_i32 : i32
    %1 = arith.addi %0, %arg1 : i32
    %c0_i32 = arith.constant 0 : i32
    %2 = arith.minsi %1, %c0_i32 : i32
    %c0_i32_0 = arith.constant 0 : i32
    %c0_i32_1 = arith.constant 0 : i32
    return %2, %c0_i32_0 : i32, i32
  }
  func.func @transform_1(%arg0: i32, %arg1: i32) -> (i32, i32) {
    %c1_i32 = arith.constant 1 : i32
    %0 = arith.muli %arg0, %c1_i32 : i32
    %1 = arith.addi %0, %arg1 : i32
    %c0_i32 = arith.constant 0 : i32
    %2 = arith.minsi %1, %c0_i32 : i32
    %c0_i32_0 = arith.constant 0 : i32
    %c0_i32_1 = arith.constant 0 : i32
    return %2, %c0_i32_0 : i32, i32
  }
  func.func @transform_2(%arg0: i32, %arg1: i32) -> (i32, i32) {
    %c0_i32 = arith.constant 0 : i32
    %c0_i32_0 = arith.constant 0 : i32
    return %arg0, %c0_i32 : i32, i32
  }
}

</mosaic_0001>

<bundles_post_ra>
// kernel: tpu_custom_call.1
= control target key start
LH: loop header
LB: loop body
LE: loop exit
PB: predicated region body
PF: predicated region fallthrough
CT: control target
= control target key end

     0   :  { %7 = vsyncpa [#allocation4], 0  ;;  %s298_s0 = inlined_call_operand.hbm [shape: f32[4,512], index: 0, kind: input, shape index: {}]   ;;  %s299_s1 = inlined_call_operand.hbm [shape: f32[4,512], index: 1, kind: input, shape index: {}]   ;;  %s300_s2 = inlined_call_operand.hbm [shape: f32[8,128], index: 2, kind: output, shape index: {}]  }
   0x1   :  { %8 = vsyncpa [#allocation7], 0 }
   0x2   :  { %9 = vsyncpa [#allocation5], 0  ;;  %s244_s9 = smov [#allocation3]   ;;  %s245_s11 = smov [#allocation6]  }
   0x3   :  { %s22_s10 = sshll.u32 %s244_s9, 4  ;;  %s38_s12 = sshll.u32 %s245_s11, 4  ;;  %s23_s10 = int_to_ptr.vmem [resolvable:$true] %s22_s10  ;;  %s39_s12 = int_to_ptr.vmem [resolvable:$true] %s38_s12 }
   0x4   :  { %s172_s15 = scalar_lea.hbm %s298_s0, 256 }
   0x5   :  { %p173_p0 = scmp.ne.s32.totalorder %s298_s0, %s172_s15  ;;  %p176_p1 = scmp.lt.u32.totalorder %s172_s15, %s298_s0 }
   0x7   :  { %p178_p2 = pnand %p176_p1, %p173_p0 }
   0x9   :  { %181 = shalt.err (!%p178_p2)
}
   0xa   :  { %s182_s20 = scalar_lea.vmem %s23_s10, 256  ;;  %p187_p4 = scmp.lt.s32.totalorder %s23_s10, %s23_s10 }
   0xb   :  { %p183_p3 = scmp.ne.s32.totalorder %s23_s10, %s182_s20  ;;  %p188_p5 = scmp.lt.s32.totalorder %s182_s20, %s182_s20 }
   0xd   :  { %p189_p6 = por %p188_p5, %p187_p4 }
   0xf   :  { %p190_p7 = pnand %p189_p6, %p183_p3 }
  0x11   :  { %193 = shalt.err (!%p190_p7)
}
  0x12   :  { %25 = dma.hbm_to_vmem [thread:$0]  %s298_s0, 256, %s23_s10, [#allocation4]  }
  0x13   :  { %s194_s25 = scalar_lea.hbm %s299_s1, 256 }
  0x14   :  { %p195_p8 = scmp.ne.s32.totalorder %s299_s1, %s194_s25  ;;  %p198_p9 = scmp.lt.u32.totalorder %s194_s25, %s299_s1 }
  0x16   :  { %p200_p10 = pnand %p198_p9, %p195_p8 }
  0x18   :  { %203 = shalt.err (!%p200_p10)
}
  0x19   :  { %s204_s30 = scalar_lea.vmem %s39_s12, 256  ;;  %p209_p12 = scmp.lt.s32.totalorder %s39_s12, %s39_s12 }
  0x1a   :  { %p205_p11 = scmp.ne.s32.totalorder %s39_s12, %s204_s30  ;;  %p210_p13 = scmp.lt.s32.totalorder %s204_s30, %s204_s30 }
  0x1c   :  { %p211_p0 = por %p210_p13, %p209_p12 }
  0x1e   :  { %p212_p1 = pnand %p211_p0, %p205_p11 }
  0x20   :  { %215 = shalt.err (!%p212_p1)
}
  0x21   :  { %41 = dma.hbm_to_vmem [thread:$0]  %s299_s1, 256, %s39_s12, [#allocation7]  }
  0x22   :  { %238 = dma.done.wait [#allocation4], 256  }
  0x23   :  { %239 = vsyncadd [#allocation4], 4294967040 }
  0x24   :  { %240 = dma.done.wait [#allocation7], 256  }
  0x25   :  { %241 = vsyncadd [#allocation7], 4294967040  ;;  %v60_v0 = vld [vmem:[#allocation3] sm:$0xff]  ;;  %v61_v1 = vld [vmem:[#allocation3 + $0x8] sm:$0xff]  ;;  %vm119_vm0 = vcmask 1043456   ;;  %s246_s1 = smov [#allocation8]  }
  0x26   :  { %v64_v2 = vadd.f32 1e-12, %v60_v0  ;;  %v65_v3 = vadd.f32 1e-12, %v61_v1  ;;  %v72_v4 = vsub.f32 1.0, %v60_v0  ;;  %v73_v5 = vsub.f32 1.0, %v61_v1 }
  0x27   :  { %v62_v8 = vld [vmem:[#allocation6] sm:$0xff]  ;;  %v63_v9 = vld [vmem:[#allocation6 + $0x8] sm:$0xff]  ;;  %v88_v24 = vmul.f32 %v60_v0, %v60_v0  ;;  %v89_v27 = vmul.f32 %v61_v1, %v61_v1  ;;  %s145_s4 = sshll.u32 %s246_s1, 4  ;;  %s146_s4 = int_to_ptr.vmem [resolvable:$true] %s145_s4 }
  0x28   :  { %164 = vlog2.f32 %v64_v2  ;;  %v80_v6 = vadd.f32 1e-12, %v72_v4  ;;  %v81_v7 = vadd.f32 1e-12, %v73_v5  ;;  %v92_v10 = vsub.f32 1.0, %v62_v8  ;;  %s216_s7 = scalar_lea.vmem %s146_s4, 128  ;;  %p221_p3 = scmp.lt.s32.totalorder %s146_s4, %s146_s4 }
  0x29   :  { %166 = vlog2.f32 %v65_v3  ;;  %v93_v11 = vsub.f32 1.0, %v63_v9  ;;  %v74_v15 = vmul.f32 %v72_v4, %v72_v4  ;;  %v75_v19 = vmul.f32 %v73_v5, %v73_v5  ;;  %p217_p2 = scmp.ne.s32.totalorder %s146_s4, %s216_s7  ;;  %p222_p4 = scmp.lt.s32.totalorder %s216_s7, %s216_s7 }
  0x2a   :  { %168 = vlog2.f32 %v80_v6  ;;  %v94_v16 = vmul.f32 %v92_v10, %v92_v10 }
  0x2b   :  { %170 = vlog2.f32 %v81_v7  ;;  %v95_v20 = vmul.f32 %v93_v11, %v93_v11  ;;  %p223_p5 = por %p222_p4, %p221_p3 }
  0x2c   :  { %v96_v30 = vmul.f32 %v94_v16, %v94_v16 }
  0x2d   :  { %v97_v33 = vmul.f32 %v95_v20, %v95_v20  ;;  %p224_p6 = pnand %p223_p5, %p217_p2 }
  0x32   :  { %v165_v12 = vpop.eup %164 }
  0x33   :  { %v167_v13 = vpop.eup %166  ;;  %v67_v14 = vmul.f32 0.6931472, %v165_v12 }
  0x34   :  { %v169_v17 = vpop.eup %168  ;;  %v69_v18 = vmul.f32 0.6931472, %v167_v13 }
  0x35   :  { %v171_v21 = vpop.eup %170  ;;  %v70_v22 = vsub.f32 0.0, %v67_v14  ;;  %v83_v23 = vmul.f32 0.6931472, %v169_v17 }
  0x36   :  { %v71_v25 = vsub.f32 0.0, %v69_v18  ;;  %v85_v26 = vmul.f32 0.6931472, %v171_v21 }
  0x37   :  { %v76_v28 = vmul.f32 %v74_v15, %v70_v22  ;;  %v86_v29 = vsub.f32 0.0, %v83_v23 }
  0x38   :  { %v77_v31 = vmul.f32 %v75_v19, %v71_v25  ;;  %v87_v32 = vsub.f32 0.0, %v85_v26 }
  0x39   :  { %v78_v34 = vmul.f32 %v76_v28, %v62_v8  ;;  %v90_v35 = vmul.f32 %v88_v24, %v86_v29 }
  0x3a   :  { %v79_v36 = vmul.f32 %v77_v31, %v63_v9  ;;  %v91_v37 = vmul.f32 %v89_v27, %v87_v32 }
  0x3b   :  { %v98_v38 = vmul.f32 %v96_v30, %v90_v35 }
  0x3c   :  { %v99_v39 = vmul.f32 %v97_v33, %v91_v37 }
  0x3d   :  { %v100_v40 = vadd.f32 %v98_v38, %v78_v34 }
  0x3e   :  { %v101_v41 = vadd.f32 %v99_v39, %v79_v36 }
  0x3f   :  { %v115_v42 = vcombine.high %v100_v40, %v100_v40  ;;  %v120_v43 = vsel %vm119_vm0, %v100_v40, 0.0 }
  0x40   :  { %v116_v44 = vcombine.high %v101_v41, %v101_v41  ;;  %v123_v46 = vsel %vm119_vm0, %v101_v41, 0.0 }
  0x41   :  { %v121_v45 = vsel %vm119_vm0, %v115_v42, 0.0 }
  0x42   :  { %v122_v47 = vadd.f32 %v121_v45, %v120_v43  ;;  %v125_v48 = vsel %vm119_vm0, %v116_v44, 0.0 }
  0x44   :  { %v124_v49 = vadd.f32 %v123_v46, %v122_v47 }
  0x46   :  { %v126_v50 = vadd.f32 %v125_v48, %v124_v49 }
  0x48   :  { %127 = vadd.xlane.f32.xlu0 %v126_v50 }
  0xd5   :  { %v128_v51 = vpop.xlane.xlu0 %127 }
  0xd6   :  { %v129_v52 = vrot.slane %v128_v51, 4 }
  0xd8   :  { %v130_v53 = vadd.f32 %v129_v52, %v128_v51 }
  0xda   :  { %v131_v54 = vrot.slane %v130_v53, 2 }
  0xdc   :  { %v132_v55 = vadd.f32 %v131_v54, %v130_v53 }
  0xde   :  { %v133_v56 = vrot.slane %v132_v55, 1 }
  0xe0   :  { %v134_v57 = vadd.f32 %v133_v56, %v132_v55 }
  0xe2   :  { %159 = vpush %v134_v57 }
 0x113   :  { %s160_s5 = spop %159 }
 0x114   :  { %s136_s6 = smul.f32 0.00048828125, %s160_s5 }
 0x116   :  { %v137_v58 = vstv %s136_s6 }
 0x117   :  { %138 = vst [vmem:[#allocation8] sm:$0xff] %v137_v58 }
 0x118   :  { %227 = shalt.err (!%p224_p6)
}
 0x119   :  { %s228_s10 = scalar_lea.hbm %s300_s2, 128 }
 0x11a   :  { %p229_p7 = scmp.ne.s32.totalorder %s300_s2, %s228_s10  ;;  %p232_p8 = scmp.lt.u32.totalorder %s228_s10, %s300_s2 }
 0x11c   :  { %p234_p9 = pnand %p232_p8, %p229_p7 }
 0x11e   :  { %237 = shalt.err (!%p234_p9)
}
 0x11f   :  { %148 = dma.vmem_to_hbm [thread:$0]  %s146_s4, 128, %s300_s2, [#allocation5]  }
 0x120   :  { %242 = dma.done.wait [#allocation5], 128  }
 0x121   :  { %243 = vsyncadd [#allocation5], 4294967168 }
 0x122   :  { %152 = vsyncpa [#allocation4], 1 }
 0x123   :  { %153 = vsyncpa [#allocation7], 1 }
 0x124   :  { %154 = vsyncpa [#allocation5], 1 }

</bundles_post_ra>
